<compile_context>
chip_gen: v7x
topology: tpu7x:2x2x1
jax: 0.10.0
libtpu: 0.0.40
codegen_flags: <defaults>
</compile_context>

<pallas_src>
import math
from functools import partial

import jax
import jax.numpy as jnp
from jax.experimental import pallas as pl
from jax.experimental.pallas import tpu as pltpu

LEAKY_SLOPE = 0.2


# ------------------------------ Pallas kernel ------------------------------

def _blur_embedding_kernel(x_ref, w0_ref, b0_ref, wr_ref, br_ref, o_ref, *,
                           n_rest, cin, slope):
    # Layer 0: (tb, Cin) @ (Cin, Cout) + b0, LeakyReLU.
    if cin == 1:
        # Degenerate contraction -> broadcast multiply on the VPU.
        h = x_ref[...] * w0_ref[...]                       # (tb,1)*(1,Cout)
    else:
        h = jnp.dot(x_ref[...], w0_ref[...],
                    preferred_element_type=jnp.float32)
    h = h + b0_ref[...]
    h = jnp.maximum(h, slope * h)                          # LeakyReLU, slope<1

    # Layers 1..block_num-1, statically unrolled inside the same kernel.
    # Intermediates never leave on-chip memory.
    for l in range(n_rest):
        h = jnp.dot(h, wr_ref[l], preferred_element_type=jnp.float32)
        h = h + br_ref[l]
        h = jnp.maximum(h, slope * h)

    o_ref[...] = h.astype(o_ref.dtype)


# ------------------------------ wrapper ------------------------------------

def _round_up(v, m):
    return ((v + m - 1) // m) * m


def blur_embedding_forward(params, x, *, block_tb=256, slope=LEAKY_SLOPE,
                           interpret=False):
    """x: (B, in_channels) -> (B, out_channels).

    All `block_num` Linear+LeakyReLU layers run in one fused Pallas kernel,
    tiled over the batch axis (grid axis marked 'parallel').
    """
    w0, b0 = params["w0"], params["b0"]
    wr, br = params["w_rest"], params["b_rest"]
    cin, cout = w0.shape
    n_rest = wr.shape[0]

    # --- pad out_channels to a lane-dense multiple of 128 (no-op if already) --
    cout_p = _round_up(cout, 128)
    if cout_p != cout:
        pc = cout_p - cout
        w0 = jnp.pad(w0, ((0, 0), (0, pc)))
        b0 = jnp.pad(b0, ((0, pc),))
        wr = jnp.pad(wr, ((0, 0), (0, pc), (0, pc)))
        br = jnp.pad(br, ((0, 0), (0, pc)))

    # --- pad / tile the batch axis (sublane multiple of 8) -------------------
    b = x.shape[0]
    tb = min(block_tb, max(8, _round_up(b, 8)))
    b_pad = _round_up(b, tb)
    x = x.astype(jnp.float32)
    if b_pad != b:
        x = jnp.pad(x, ((0, b_pad - b), (0, 0)))

    kernel = partial(_blur_embedding_kernel, n_rest=n_rest, cin=cin, slope=slope)
    out = pl.pallas_call(
        kernel,
        out_shape=jax.ShapeDtypeStruct((b_pad, cout_p), jnp.float32),
        grid=(b_pad // tb,),
        in_specs=[
            pl.BlockSpec((tb, cin), lambda i: (i, 0)),               # batch tile of x
            pl.BlockSpec((cin, cout_p), lambda i: (0, 0)),           # layer-0 weight (resident)
            pl.BlockSpec((1, cout_p), lambda i: (0, 0)),             # layer-0 bias
            pl.BlockSpec((n_rest, cout_p, cout_p), lambda i: (0, 0, 0)),  # stacked weights 1..5
            pl.BlockSpec((n_rest, 1, cout_p), lambda i: (0, 0, 0)),       # stacked biases  1..5
        ],
        out_specs=pl.BlockSpec((tb, cout_p), lambda i: (i, 0)),
        compiler_params=pltpu.CompilerParams(
            dimension_semantics=("parallel",),   # batch tiles are independent (megacore)
            vmem_limit_bytes=32 * 1024 * 1024,
        ),
        interpret=interpret,
    )(x, w0, b0.reshape(1, cout_p), wr, br.reshape(n_rest, 1, cout_p))
    return out[:b, :cout]


# --------------------------- parameters / reference -------------------------

def init_blur_embedding_params(key, in_channels, out_channels, block_num=6):
    # PyTorch nn.Linear default init: U(-1/sqrt(fan_in), 1/sqrt(fan_in)).
    def lin(kw, kb, fin, fout):
        bound = 1.0 / math.sqrt(fin)
        w = jax.random.uniform(kw, (fin, fout), jnp.float32, -bound, bound)
        b = jax.random.uniform(kb, (fout,), jnp.float32, -bound, bound)
        return w, b

    keys = jax.random.split(key, 2 * block_num)
    w0, b0 = lin(keys[0], keys[1], in_channels, out_channels)
    ws, bs = [], []
    for i in range(1, block_num):
        w, b = lin(keys[2 * i], keys[2 * i + 1], out_channels, out_channels)
        ws.append(w)
        bs.append(b)
    return {
        "w0": w0, "b0": b0,
        "w_rest": jnp.stack(ws),   # (block_num-1, Cout, Cout)
        "b_rest": jnp.stack(bs),   # (block_num-1, Cout)
    }


def blur_embedding_reference(params, x, slope=LEAKY_SLOPE):
    hi = jax.lax.Precision.HIGHEST
    h = jnp.dot(x.astype(jnp.float32), params["w0"], precision=hi) + params["b0"]
    h = jnp.where(h > 0, h, slope * h)
    for l in range(params["w_rest"].shape[0]):
        h = jnp.dot(h, params["w_rest"][l], precision=hi) + params["b_rest"][l]
        h = jnp.where(h > 0, h, slope * h)
    return h


# ----------------------------------- main -----------------------------------

if __name__ == "__main__":
    IN_CH, OUT_CH, BLOCKS = 1, 128, 6     # BlurEmbedding(1, dim_3) as used in ID-Blau
    B = 16                                # small demo batch of blur ratios

    key = jax.random.PRNGKey(0)
    kp, kx = jax.random.split(key)
    params = init_blur_embedding_params(kp, IN_CH, OUT_CH, BLOCKS)
    x = jax.random.uniform(kx, (B, IN_CH), jnp.float32)   # blur ratio in [0, 1)

    fwd = jax.jit(blur_embedding_forward)
    out = fwd(params, x)
    jax.block_until_ready(out)

    ref = blur_embedding_reference(params, x)
    assert out.shape == (B, OUT_CH), out.shape
    assert bool(jnp.all(jnp.isfinite(out)))
    assert bool(jnp.allclose(out, ref, atol=1e-3, rtol=1e-3)), \
        float(jnp.max(jnp.abs(out - ref)))
    print("KERNEL_OK")
</pallas_src>

<mosaic_0001>
module attributes {stable_mosaic.version = 11 : i64} {
  func.func @_blur_embedding_kernel(%arg0: i32, %arg1: memref<16x1xf32, #tpu.memory_space<vmem>>, %arg2: memref<1x128xf32, #tpu.memory_space<vmem>>, %arg3: memref<1x128xf32, #tpu.memory_space<vmem>>, %arg4: memref<5x128x128xf32, #tpu.memory_space<vmem>>, %arg5: memref<5x1x128xf32, #tpu.memory_space<vmem>>, %arg6: memref<16x128xf32, #tpu.memory_space<vmem>>) attributes {dimension_semantics = [#tpu.dimension_semantics<parallel>], iteration_bounds = array<i64: 1>, scalar_prefetch = 0 : i64, scratch_operands = 0 : i64, tpu.core_type = #tpu.core_type<tc>, window_params = [{transform_indices = @transform_0, window_bounds = array<i64: 16, 1>}, {pipeline_mode = #tpu.pipeline_mode<synchronous>, transform_indices = @transform_1, window_bounds = array<i64: 1, 128>}, {pipeline_mode = #tpu.pipeline_mode<synchronous>, transform_indices = @transform_2, window_bounds = array<i64: 1, 128>}, {pipeline_mode = #tpu.pipeline_mode<synchronous>, transform_indices = @transform_3, window_bounds = array<i64: 5, 128, 128>}, {pipeline_mode = #tpu.pipeline_mode<synchronous>, transform_indices = @transform_4, window_bounds = array<i64: 5, 1, 128>}, {transform_indices = @transform_5, window_bounds = array<i64: 16, 128>}]} {
    %c0 = arith.constant 0 : index
    %c0_0 = arith.constant 0 : index
    %0 = vector.load %arg1[%c0, %c0_0] : memref<16x1xf32, #tpu.memory_space<vmem>>, vector<16x1xf32>
    %c0_1 = arith.constant 0 : index
    %c0_2 = arith.constant 0 : index
    %1 = vector.load %arg2[%c0_1, %c0_2] : memref<1x128xf32, #tpu.memory_space<vmem>>, vector<1x128xf32>
    %2 = vector.broadcast %0 : vector<16x1xf32> to vector<16x128xf32>
    %3 = vector.broadcast %1 : vector<1x128xf32> to vector<16x128xf32>
    %4 = arith.mulf %2, %3 : vector<16x128xf32>
    %c0_3 = arith.constant 0 : index
    %c0_4 = arith.constant 0 : index
    %5 = vector.load %arg3[%c0_3, %c0_4] : memref<1x128xf32, #tpu.memory_space<vmem>>, vector<1x128xf32>
    %6 = vector.broadcast %5 : vector<1x128xf32> to vector<16x128xf32>
    %7 = arith.addf %4, %6 : vector<16x128xf32>
    %cst = arith.constant 2.000000e-01 : f32
    %8 = vector.broadcast %cst : f32 to vector<16x128xf32>
    %9 = arith.mulf %8, %7 : vector<16x128xf32>
    %10 = arith.maximumf %7, %9 : vector<16x128xf32>
    %c0_5 = arith.constant 0 : index
    %c0_6 = arith.constant 0 : index
    %c0_7 = arith.constant 0 : index
    %11 = vector.load %arg4[%c0_5, %c0_6, %c0_7] : memref<5x128x128xf32, #tpu.memory_space<vmem>>, vector<1x128x128xf32>
    %12 = vector.shape_cast %11 : vector<1x128x128xf32> to vector<128x128xf32>
    %cst_8 = arith.constant dense<0.000000e+00> : vector<16x128xf32>
    %13 = tpu.matmul %10, %12, %cst_8 {dimension_numbers = #tpu.dot_dimension_numbers<[1], [0], [0], [1], [0, 0, 1, 1], [], []>} : vector<16x128xf32>, vector<128x128xf32>, vector<16x128xf32> -> vector<16x128xf32>
    %c0_9 = arith.constant 0 : index
    %c0_10 = arith.constant 0 : index
    %c0_11 = arith.constant 0 : index
    %14 = vector.load %arg5[%c0_9, %c0_10, %c0_11] : memref<5x1x128xf32, #tpu.memory_space<vmem>>, vector<1x1x128xf32>
    %15 = vector.shape_cast %14 : vector<1x1x128xf32> to vector<1x128xf32>
    %16 = vector.broadcast %15 : vector<1x128xf32> to vector<16x128xf32>
    %17 = arith.addf %13, %16 : vector<16x128xf32>
    %cst_12 = arith.constant 2.000000e-01 : f32
    %18 = vector.broadcast %cst_12 : f32 to vector<16x128xf32>
    %19 = arith.mulf %18, %17 : vector<16x128xf32>
    %20 = arith.maximumf %17, %19 : vector<16x128xf32>
    %c1 = arith.constant 1 : index
    %c0_13 = arith.constant 0 : index
    %c0_14 = arith.constant 0 : index
    %21 = vector.load %arg4[%c1, %c0_13, %c0_14] : memref<5x128x128xf32, #tpu.memory_space<vmem>>, vector<1x128x128xf32>
    %22 = vector.shape_cast %21 : vector<1x128x128xf32> to vector<128x128xf32>
    %cst_15 = arith.constant dense<0.000000e+00> : vector<16x128xf32>
    %23 = tpu.matmul %20, %22, %cst_15 {dimension_numbers = #tpu.dot_dimension_numbers<[1], [0], [0], [1], [0, 0, 1, 1], [], []>} : vector<16x128xf32>, vector<128x128xf32>, vector<16x128xf32> -> vector<16x128xf32>
    %c1_16 = arith.constant 1 : index
    %c0_17 = arith.constant 0 : index
    %c0_18 = arith.constant 0 : index
    %24 = vector.load %arg5[%c1_16, %c0_17, %c0_18] : memref<5x1x128xf32, #tpu.memory_space<vmem>>, vector<1x1x128xf32>
    %25 = vector.shape_cast %24 : vector<1x1x128xf32> to vector<1x128xf32>
    %26 = vector.broadcast %25 : vector<1x128xf32> to vector<16x128xf32>
    %27 = arith.addf %23, %26 : vector<16x128xf32>
    %cst_19 = arith.constant 2.000000e-01 : f32
    %28 = vector.broadcast %cst_19 : f32 to vector<16x128xf32>
    %29 = arith.mulf %28, %27 : vector<16x128xf32>
    %30 = arith.maximumf %27, %29 : vector<16x128xf32>
    %c2 = arith.constant 2 : index
    %c0_20 = arith.constant 0 : index
    %c0_21 = arith.constant 0 : index
    %31 = vector.load %arg4[%c2, %c0_20, %c0_21] : memref<5x128x128xf32, #tpu.memory_space<vmem>>, vector<1x128x128xf32>
    %32 = vector.shape_cast %31 : vector<1x128x128xf32> to vector<128x128xf32>
    %cst_22 = arith.constant dense<0.000000e+00> : vector<16x128xf32>
    %33 = tpu.matmul %30, %32, %cst_22 {dimension_numbers = #tpu.dot_dimension_numbers<[1], [0], [0], [1], [0, 0, 1, 1], [], []>} : vector<16x128xf32>, vector<128x128xf32>, vector<16x128xf32> -> vector<16x128xf32>
    %c2_23 = arith.constant 2 : index
    %c0_24 = arith.constant 0 : index
    %c0_25 = arith.constant 0 : index
    %34 = vector.load %arg5[%c2_23, %c0_24, %c0_25] : memref<5x1x128xf32, #tpu.memory_space<vmem>>, vector<1x1x128xf32>
    %35 = vector.shape_cast %34 : vector<1x1x128xf32> to vector<1x128xf32>
    %36 = vector.broadcast %35 : vector<1x128xf32> to vector<16x128xf32>
    %37 = arith.addf %33, %36 : vector<16x128xf32>
    %cst_26 = arith.constant 2.000000e-01 : f32
    %38 = vector.broadcast %cst_26 : f32 to vector<16x128xf32>
    %39 = arith.mulf %38, %37 : vector<16x128xf32>
    %40 = arith.maximumf %37, %39 : vector<16x128xf32>
    %c3 = arith.constant 3 : index
    %c0_27 = arith.constant 0 : index
    %c0_28 = arith.constant 0 : index
    %41 = vector.load %arg4[%c3, %c0_27, %c0_28] : memref<5x128x128xf32, #tpu.memory_space<vmem>>, vector<1x128x128xf32>
    %42 = vector.shape_cast %41 : vector<1x128x128xf32> to vector<128x128xf32>
    %cst_29 = arith.constant dense<0.000000e+00> : vector<16x128xf32>
    %43 = tpu.matmul %40, %42, %cst_29 {dimension_numbers = #tpu.dot_dimension_numbers<[1], [0], [0], [1], [0, 0, 1, 1], [], []>} : vector<16x128xf32>, vector<128x128xf32>, vector<16x128xf32> -> vector<16x128xf32>
    %c3_30 = arith.constant 3 : index
    %c0_31 = arith.constant 0 : index
    %c0_32 = arith.constant 0 : index
    %44 = vector.load %arg5[%c3_30, %c0_31, %c0_32] : memref<5x1x128xf32, #tpu.memory_space<vmem>>, vector<1x1x128xf32>
    %45 = vector.shape_cast %44 : vector<1x1x128xf32> to vector<1x128xf32>
    %46 = vector.broadcast %45 : vector<1x128xf32> to vector<16x128xf32>
    %47 = arith.addf %43, %46 : vector<16x128xf32>
    %cst_33 = arith.constant 2.000000e-01 : f32
    %48 = vector.broadcast %cst_33 : f32 to vector<16x128xf32>
    %49 = arith.mulf %48, %47 : vector<16x128xf32>
    %50 = arith.maximumf %47, %49 : vector<16x128xf32>
    %c4 = arith.constant 4 : index
    %c0_34 = arith.constant 0 : index
    %c0_35 = arith.constant 0 : index
    %51 = vector.load %arg4[%c4, %c0_34, %c0_35] : memref<5x128x128xf32, #tpu.memory_space<vmem>>, vector<1x128x128xf32>
    %52 = vector.shape_cast %51 : vector<1x128x128xf32> to vector<128x128xf32>
    %cst_36 = arith.constant dense<0.000000e+00> : vector<16x128xf32>
    %53 = tpu.matmul %50, %52, %cst_36 {dimension_numbers = #tpu.dot_dimension_numbers<[1], [0], [0], [1], [0, 0, 1, 1], [], []>} : vector<16x128xf32>, vector<128x128xf32>, vector<16x128xf32> -> vector<16x128xf32>
    %c4_37 = arith.constant 4 : index
    %c0_38 = arith.constant 0 : index
    %c0_39 = arith.constant 0 : index
    %54 = vector.load %arg5[%c4_37, %c0_38, %c0_39] : memref<5x1x128xf32, #tpu.memory_space<vmem>>, vector<1x1x128xf32>
    %55 = vector.shape_cast %54 : vector<1x1x128xf32> to vector<1x128xf32>
    %56 = vector.broadcast %55 : vector<1x128xf32> to vector<16x128xf32>
    %57 = arith.addf %53, %56 : vector<16x128xf32>
    %cst_40 = arith.constant 2.000000e-01 : f32
    %58 = vector.broadcast %cst_40 : f32 to vector<16x128xf32>
    %59 = arith.mulf %58, %57 : vector<16x128xf32>
    %60 = arith.maximumf %57, %59 : vector<16x128xf32>
    %c0_41 = arith.constant 0 : index
    %c0_42 = arith.constant 0 : index
    %61 = vector.load %arg6[%c0_41, %c0_42] : memref<16x128xf32, #tpu.memory_space<vmem>>, vector<16x128xf32>
    tpu.vector_store %arg6[%c0_41, %c0_42], %60 {strides = array<i32>} : memref<16x128xf32, #tpu.memory_space<vmem>>, vector<16x128xf32>,
    return
  }
  func.func @transform_0(%arg0: i32) -> (i32, i32) {
    %c0_i32 = arith.constant 0 : i32
    %c0_i32_0 = arith.constant 0 : i32
    return %arg0, %c0_i32 : i32, i32
  }
  func.func @transform_1(%arg0: i32) -> (i32, i32) {
    %c0_i32 = arith.constant 0 : i32
    %c0_i32_0 = arith.constant 0 : i32
    %c0_i32_1 = arith.constant 0 : i32
    return %c0_i32, %c0_i32_0 : i32, i32
  }
  func.func @transform_2(%arg0: i32) -> (i32, i32) {
    %c0_i32 = arith.constant 0 : i32
    %c0_i32_0 = arith.constant 0 : i32
    %c0_i32_1 = arith.constant 0 : i32
    return %c0_i32, %c0_i32_0 : i32, i32
  }
  func.func @transform_3(%arg0: i32) -> (i32, i32, i32) {
    %c0_i32 = arith.constant 0 : i32
    %c0_i32_0 = arith.constant 0 : i32
    %c0_i32_1 = arith.constant 0 : i32
    %c0_i32_2 = arith.constant 0 : i32
    return %c0_i32, %c0_i32_0, %c0_i32_1 : i32, i32, i32
  }
  func.func @transform_4(%arg0: i32) -> (i32, i32, i32) {
    %c0_i32 = arith.constant 0 : i32
    %c0_i32_0 = arith.constant 0 : i32
    %c0_i32_1 = arith.constant 0 : i32
    %c0_i32_2 = arith.constant 0 : i32
    return %c0_i32, %c0_i32_0, %c0_i32_1 : i32, i32, i32
  }
  func.func @transform_5(%arg0: i32) -> (i32, i32) {
    %c0_i32 = arith.constant 0 : i32
    %c0_i32_0 = arith.constant 0 : i32
    return %arg0, %c0_i32 : i32, i32
  }
}

</mosaic_0001>

<bundles_post_ra>
// kernel: blur_embedding_forward.1
= control target key start
LH: loop header
LB: loop body
LE: loop exit
PB: predicated region body
PF: predicated region fallthrough
CT: control target
= control target key end

     0   :  { %10 = vsyncpa [#allocation3], 0  ;;  %s1188_s0 = inlined_call_operand.vmem [shape: f32[16,1], index: 0, kind: input, shape index: {}]   ;;  %s1189_s1 = inlined_call_operand.vmem [shape: f32[1,128], index: 1, kind: input, shape index: {}]   ;;  %s1190_s2 = inlined_call_operand.vmem [shape: f32[1,128], index: 2, kind: input, shape index: {}]   ;;  %s1191_s3 = inlined_call_operand.hbm [shape: f32[5,128,128], index: 3, kind: input, shape index: {}]   ;;  %s1192_s4 = inlined_call_operand.vmem [shape: f32[5,1,128], index: 4, kind: input, shape index: {}]   ;;  %s1193_s5 = inlined_call_operand.hbm [shape: f32[16,128], index: 5, kind: output, shape index: {}]  }
   0x1   :  { %11 = vsyncpa [#allocation4], 0  ;;  %s1096_s18 = smov [#allocation2]   ;;  %s1048_s22 = scalar_lea.hbm %s1191_s3, 10240 }
   0x2   :  { %s23_s19 = sshll.u32 %s1096_s18, 4  ;;  %p1049_p0 = scmp.ne.s32.totalorder %s1191_s3, %s1048_s22  ;;  %s24_s19 = int_to_ptr.vmem [resolvable:$true] %s23_s19 }
   0x3   :  { %p1052_p1 = scmp.lt.u32.totalorder %s1048_s22, %s1191_s3 }
   0x5   :  { %p1054_p2 = pnand %p1052_p1, %p1049_p0 }
   0x7   :  { %1057 = shalt.err (!%p1054_p2)
}
   0x8   :  { %s1058_s27 = scalar_lea.vmem %s24_s19, 10240  ;;  %p1063_p4 = scmp.lt.s32.totalorder %s24_s19, %s24_s19 }
   0x9   :  { %p1059_p3 = scmp.ne.s32.totalorder %s24_s19, %s1058_s27  ;;  %p1064_p5 = scmp.lt.s32.totalorder %s1058_s27, %s1058_s27 }
   0xb   :  { %p1065_p6 = por %p1064_p5, %p1063_p4 }
   0xd   :  { %p1066_p7 = pnand %p1065_p6, %p1059_p3 }
   0xf   :  { %1069 = shalt.err (!%p1066_p7)
}
  0x10   :  { %s1097_s28 = smov 128   ;;  %s1098_s29 = smov 8  }
  0x11   :  { %29 = dma.hbm_to_vmem [thread:$0]  %s1191_s3, 10240, %s24_s19, [#allocation3], %s1097_s28, %s1097_s28, %s1098_s29  }
  0x12   :  { %1092 = dma.done.wait [#allocation3], 10240  }
  0x13   :  { %1093 = vsyncadd [#allocation3], 4294957056  ;;  %v1099_v0 = vmov 0   ;;  %v35_v1 = vld [vmem:[%s1188_s0] sm:$0xff]  ;;  %v70_v3 = vld [vmem:[#allocation2 + $0x8] sm:$0xff]  ;;  %s1100_s21 = smov [#allocation5]  }
  0x14   :  { %1047 = vset.pattern.permute.xlu0 %v1099_v0  ;;  %v69_v2 = vld [vmem:[#allocation2] sm:$0xff]  ;;  %v71_v4 = vld [vmem:[#allocation2 + $0x10] sm:$0xff]  ;;  %v72_v5 = vld [vmem:[#allocation2 + $0x18] sm:$0xff]  ;;  %s594_s22 = sshll.u32 %s1100_s21, 4  ;;  %s595_s22 = int_to_ptr.vmem [resolvable:$true] %s594_s22 }
  0x15   :  { %40 = vperm.xlu0 %1047, %v35_v1   ;;  %v36_v6 = vld [vmem:[%s1188_s0 + $0x8] sm:$0xff]  ;;  %v882_v7 = vpack.c.bf16 %v70_v3, %v69_v2  ;;  %v886_v8 = vpack.c.bf16 %v72_v5, %v71_v4  ;;  %v73_v9 = vld [vmem:[#allocation2 + $0x20] sm:$0xff]  ;;  %v75_v12 = vld [vmem:[#allocation2 + $0x30] sm:$0xff]  ;;  %s1070_s23 = scalar_lea.vmem %s595_s22, 256  ;;  %p1075_p9 = scmp.lt.s32.totalorder %s595_s22, %s595_s22 }
  0x16   :  { %v74_v10 = vld [vmem:[#allocation2 + $0x28] sm:$0xff]  ;;  %v76_v13 = vld [vmem:[#allocation2 + $0x38] sm:$0xff]  ;;  %v77_v15 = vld [vmem:[#allocation2 + $0x40] sm:$0xff]  ;;  %p1071_p8 = scmp.ne.s32.totalorder %s595_s22, %s1070_s23  ;;  %p1076_p10 = scmp.lt.s32.totalorder %s1070_s23, %s1070_s23 }
  0x17   :  { %883 = vmatprep.subr.bf16.mxu0 %v882_v7  ;;  %v890_v11 = vpack.c.bf16 %v74_v10, %v73_v9  ;;  %v894_v14 = vpack.c.bf16 %v76_v13, %v75_v12  ;;  %v78_v16 = vld [vmem:[#allocation2 + $0x48] sm:$0xff]  ;;  %v172_v17 = vld [vmem:[#allocation2 + $0x80] sm:$0xff]  ;;  %v174_v19 = vld [vmem:[#allocation2 + $0x90] sm:$0xff] }
  0x18   :  { %885 = vmatpush3.bf16.msra.mxu0 %v882_v7  ;;  %v173_v18 = vld [vmem:[#allocation2 + $0x88] sm:$0xff]  ;;  %v898_v20 = vpack.c.bf16 %v78_v16, %v77_v15  ;;  %v79_v21 = vld [vmem:[#allocation2 + $0x50] sm:$0xff]  ;;  %v175_v23 = vld [vmem:[#allocation2 + $0x98] sm:$0xff]  ;;  %p1077_p11 = por %p1076_p10, %p1075_p9 }
  0x19   :  { %45 = vperm.xlu0 %1047, %v36_v6   ;;  %887 = vmatprep.subr.bf16.mxu0 %v886_v8  ;;  %v914_v22 = vpack.c.bf16 %v173_v18, %v172_v17  ;;  %v80_v24 = vld [vmem:[#allocation2 + $0x58] sm:$0xff]  ;;  %v918_v25 = vpack.c.bf16 %v175_v23, %v174_v19  ;;  %v176_v26 = vld [vmem:[#allocation2 + $0xa0] sm:$0xff]  ;;  %v177_v27 = vld [vmem:[#allocation2 + $0xa8] sm:$0xff] }
  0x1a   :  { %v902_v28 = vpack.c.bf16 %v80_v24, %v79_v21  ;;  %v81_v29 = vld [vmem:[#allocation2 + $0x60] sm:$0xff]  ;;  %v922_v30 = vpack.c.bf16 %v177_v27, %v176_v26  ;;  %v82_v31 = vld [vmem:[#allocation2 + $0x68] sm:$0xff]  ;;  %v178_v32 = vld [vmem:[#allocation2 + $0xb0] sm:$0xff]  ;;  %p1078_p12 = pnand %p1077_p11, %p1071_p8 }
  0x1b   :  { %915 = vmatprep.subr.bf16.mxu1 %v914_v22  ;;  %v179_v33 = vld [vmem:[#allocation2 + $0xb8] sm:$0xff]  ;;  %v906_v34 = vpack.c.bf16 %v82_v31, %v81_v29  ;;  %v83_v35 = vld [vmem:[#allocation2 + $0x70] sm:$0xff]  ;;  %v180_v38 = vld [vmem:[#allocation2 + $0xc0] sm:$0xff] }
  0x1c   :  { %889 = vmatpush3.bf16.msra.mxu0 %v886_v8  ;;  %917 = vmatpush3.bf16.msra.mxu1 %v914_v22  ;;  %v926_v36 = vpack.c.bf16 %v179_v33, %v178_v32  ;;  %v84_v37 = vld [vmem:[#allocation2 + $0x78] sm:$0xff]  ;;  %v181_v39 = vld [vmem:[#allocation2 + $0xc8] sm:$0xff]  ;;  %v182_v42 = vld [vmem:[#allocation2 + $0xd0] sm:$0xff] }
  0x1d   :  { %891 = vmatprep.subr.bf16.mxu0 %v890_v11  ;;  %919 = vmatprep.subr.bf16.mxu1 %v918_v25  ;;  %v910_v40 = vpack.c.bf16 %v84_v37, %v83_v35  ;;  %v930_v41 = vpack.c.bf16 %v181_v39, %v180_v38  ;;  %v183_v43 = vld [vmem:[#allocation2 + $0xd8] sm:$0xff]  ;;  %v606_v45 = vld [vmem:[%s1189_s1] ss:$0 sm:$0xff]  ;;  %v185_v58 = vld [vmem:[#allocation2 + $0xe8] sm:$0xff] }
  0x1e   :  { %v934_v44 = vpack.c.bf16 %v183_v43, %v182_v42  ;;  %v607_v47 = vld [vmem:[%s1190_s2] ss:$0 sm:$0xff]  ;;  %v186_v60 = vld [vmem:[#allocation2 + $0xf0] sm:$0xff]  ;;  %v187_v61 = vld [vmem:[#allocation2 + $0xf8] sm:$0xff] }
  0x1f   :  { %v184_v57 = vld [vmem:[#allocation2 + $0xe0] sm:$0xff]  ;;  %v942_v62 = vpack.c.bf16 %v187_v61, %v186_v60  ;;  %v277_v0 = vld [vmem:[#allocation2 + $0x108] sm:$0xff]  ;;  %v278_v1 = vld [vmem:[#allocation2 + $0x110] sm:$0xff] }
  0x20   :  { %893 = vmatpush3.bf16.msra.mxu0 %v890_v11  ;;  %921 = vmatpush3.bf16.msra.mxu1 %v918_v25  ;;  %v938_v59 = vpack.c.bf16 %v185_v58, %v184_v57  ;;  %v276_v63 = vld [vmem:[#allocation2 + $0x100] sm:$0xff]  ;;  %v279_v3 = vld [vmem:[#allocation2 + $0x118] sm:$0xff]  ;;  %v281_v6 = vld [vmem:[#allocation2 + $0x128] sm:$0xff] }
  0x21   :  { %895 = vmatprep.subr.bf16.mxu0 %v894_v14  ;;  %923 = vmatprep.subr.bf16.mxu1 %v922_v30  ;;  %v946_v2 = vpack.c.bf16 %v277_v0, %v276_v63  ;;  %v950_v4 = vpack.c.bf16 %v279_v3, %v278_v1  ;;  %v280_v5 = vld [vmem:[#allocation2 + $0x120] sm:$0xff]  ;;  %v282_v8 = vld [vmem:[#allocation2 + $0x130] sm:$0xff]  ;;  %v283_v9 = vld [vmem:[#allocation2 + $0x138] sm:$0xff] }
  0x22   :  { %v954_v7 = vpack.c.bf16 %v281_v6, %v280_v5  ;;  %v958_v10 = vpack.c.bf16 %v283_v9, %v282_v8  ;;  %v284_v11 = vld [vmem:[#allocation2 + $0x140] sm:$0xff]  ;;  %v285_v12 = vld [vmem:[#allocation2 + $0x148] sm:$0xff]  ;;  %v287_v15 = vld [vmem:[#allocation2 + $0x158] sm:$0xff] }
  0x23   :  { %v962_v13 = vpack.c.bf16 %v285_v12, %v284_v11  ;;  %v608_v17 = vld [vmem:[%s1192_s4] ss:$0 sm:$0xff]  ;;  %v289_v27 = vld [vmem:[#allocation2 + $0x168] sm:$0xff]  ;;  %v290_v29 = vld [vmem:[#allocation2 + $0x170] sm:$0xff] }
  0x24   :  { %897 = vmatpush3.bf16.msra.mxu0 %v894_v14  ;;  %925 = vmatpush3.bf16.msra.mxu1 %v922_v30  ;;  %v286_v14 = vld [vmem:[#allocation2 + $0x150] sm:$0xff]  ;;  %v288_v26 = vld [vmem:[#allocation2 + $0x160] sm:$0xff]  ;;  %v291_v30 = vld [vmem:[#allocation2 + $0x178] sm:$0xff] }
  0x25   :  { %899 = vmatprep.subr.bf16.mxu0 %v898_v20  ;;  %927 = vmatprep.subr.bf16.mxu1 %v926_v36  ;;  %v966_v16 = vpack.c.bf16 %v287_v15, %v286_v14  ;;  %v974_v31 = vpack.c.bf16 %v291_v30, %v290_v29  ;;  %v380_v32 = vld [vmem:[#allocation2 + $0x180] sm:$0xff]  ;;  %v381_v33 = vld [vmem:[#allocation2 + $0x188] sm:$0xff]  ;;  %v387_v42 = vld [vmem:[#allocation2 + $0x1b8] sm:$0xff] }
  0x26   :  { %v978_v35 = vpack.c.bf16 %v381_v33, %v380_v32  ;;  %v384_v38 = vld [vmem:[#allocation2 + $0x1a0] sm:$0xff]  ;;  %v385_v39 = vld [vmem:[#allocation2 + $0x1a8] sm:$0xff]  ;;  %v395_v63 = vld [vmem:[#allocation2 + $0x1f8] sm:$0xff] }
  0x27   :  { %v393_v60 = vld [vmem:[#allocation2 + $0x1e8] sm:$0xff]  ;;  %v484_v1 = vld [vmem:[#allocation2 + $0x200] sm:$0xff]  ;;  %v486_v3 = vld [vmem:[#allocation2 + $0x210] sm:$0xff] }
  0x28   :  { %901 = vmatpush3.bf16.msra.mxu0 %v898_v20  ;;  %929 = vmatpush3.bf16.msra.mxu1 %v926_v36  ;;  %v383_v36 = vld [vmem:[#allocation2 + $0x198] sm:$0xff]  ;;  %v489_v8 = vld [vmem:[#allocation2 + $0x228] sm:$0xff] }
  0x29   :  { %903 = vmatprep.subr.bf16.mxu0 %v902_v28  ;;  %931 = vmatprep.subr.bf16.mxu1 %v930_v41  ;;  %v487_v5 = vld [vmem:[#allocation2 + $0x218] sm:$0xff]  ;;  %v493_v14 = vld [vmem:[#allocation2 + $0x248] sm:$0xff] }
  0x2a   :  { %v1014_v6 = vpack.c.bf16 %v487_v5, %v486_v3  ;;  %v491_v11 = vld [vmem:[#allocation2 + $0x238] sm:$0xff]  ;;  %v497_v29 = vld [vmem:[#allocation2 + $0x268] sm:$0xff] }
  0x2b   :  { %v499_v32 = vld [vmem:[#allocation2 + $0x278] sm:$0xff] }
  0x2c   :  { %905 = vmatpush3.bf16.msra.mxu0 %v902_v28  ;;  %933 = vmatpush3.bf16.msra.mxu1 %v930_v41  ;;  %v970_v28 = vpack.c.bf16 %v289_v27, %v288_v26  ;;  %v386_v41 = vld [vmem:[#allocation2 + $0x1b0] sm:$0xff] }
  0x2d   :  { %907 = vmatprep.subr.bf16.mxu0 %v906_v34  ;;  %935 = vmatprep.subr.bf16.mxu1 %v934_v44  ;;  %v990_v43 = vpack.c.bf16 %v387_v42, %v386_v41 }
  0x30   :  { %909 = vmatpush3.bf16.msra.mxu0 %v906_v34  ;;  %937 = vmatpush3.bf16.msra.mxu1 %v934_v44  ;;  %v382_v34 = vld [vmem:[#allocation2 + $0x190] sm:$0xff]  ;;  %v388_v44 = vld [vmem:[#allocation2 + $0x1c0] sm:$0xff] }
  0x31   :  { %911 = vmatprep.subr.bf16.mxu0 %v910_v40  ;;  %939 = vmatprep.subr.bf16.mxu1 %v938_v59  ;;  %v982_v37 = vpack.c.bf16 %v383_v36, %v382_v34  ;;  %v614_v34 = vld [vmem:[%s1192_s4 + $0x3] ss:$0 sm:$0xff] }
  0x34   :  { %913 = vmatpush3.bf16.msra.mxu0 %v910_v40  ;;  %941 = vmatpush3.bf16.msra.mxu1 %v938_v59  ;;  %v986_v40 = vpack.c.bf16 %v385_v39, %v384_v38  ;;  %v392_v59 = vld [vmem:[#allocation2 + $0x1e0] sm:$0xff] }
  0x35   :  { %943 = vmatprep.subr.bf16.mxu1 %v942_v62  ;;  %947 = vmatprep.subr.bf16.mxu0 %v946_v2  ;;  %v1002_v61 = vpack.c.bf16 %v393_v60, %v392_v59 }
  0x38   :  { %945 = vmatpush3.bf16.msra.mxu1 %v942_v62  ;;  %v394_v62 = vld [vmem:[#allocation2 + $0x1f0] sm:$0xff] }
  0x39   :  { %979 = vmatprep.subr.bf16.mxu1 %v978_v35  ;;  %v1006_v0 = vpack.c.bf16 %v395_v63, %v394_v62 }
  0x94   :  { %v41_v46 = vpop.permute.xlu0 %40 }
  0x95   :  { %v54_v48 = vmul.f32 %v606_v45, %v41_v46 }
  0x97   :  { %v63_v49 = vadd.f32 %v607_v47, %v54_v48  ;;  %v391_v48 = vld [vmem:[#allocation2 + $0x1d8] sm:$0xff] }
  0x98   :  { %v46_v50 = vpop.permute.xlu0 %45 }
  0x99   :  { %v55_v51 = vmul.f32 %v606_v45, %v46_v50  ;;  %v65_v52 = vmul.f32 0.2, %v63_v49  ;;  %v389_v45 = vld [vmem:[#allocation2 + $0x1c8] sm:$0xff]  ;;  %v610_v50 = vld [vmem:[%s1192_s4 + $0x1] ss:$0 sm:$0xff] }
  0x9a   :  { %v994_v46 = vpack.c.bf16 %v389_v45, %v388_v44 }
  0x9b   :  { %v64_v53 = vadd.f32 %v607_v47, %v55_v51  ;;  %v67_v54 = vmax.f32 %v63_v49, %v65_v52  ;;  %v390_v47 = vld [vmem:[#allocation2 + $0x1d0] sm:$0xff] }
  0x9c   :  { %v998_v49 = vpack.c.bf16 %v391_v48, %v390_v47 }
  0x9d   :  { %v66_v55 = vmul.f32 0.2, %v64_v53  ;;  %739 = vmatprep.mubr.f32.mxu0 %v67_v54 }
  0x9f   :  { %v68_v56 = vmax.f32 %v64_v53, %v66_v55 }
  0xa1   :  { %740 = vmatmul.mubr.f32.vlgmr.msra.gmra.mrb[0].mxu0 %v68_v56 }
  0xa2   :  { %949 = vmatpush3.bf16.msra.mxu0 %v946_v2  ;;  %v485_v2 = vld [vmem:[#allocation2 + $0x208] sm:$0xff] }
  0xa3   :  { %951 = vmatprep.subr.bf16.mxu0 %v950_v4 }
  0xa6   :  { %953 = vmatpush3.bf16.msra.mxu0 %v950_v4  ;;  %v1010_v4 = vpack.c.bf16 %v485_v2, %v484_v1 }
  0xa7   :  { %955 = vmatprep.subr.bf16.mxu0 %v954_v7 }
  0xaa   :  { %957 = vmatpush3.bf16.msra.mxu0 %v954_v7  ;;  %v488_v7 = vld [vmem:[#allocation2 + $0x220] sm:$0xff] }
  0xab   :  { %959 = vmatprep.subr.bf16.mxu0 %v958_v10  ;;  %v1018_v9 = vpack.c.bf16 %v489_v8, %v488_v7 }
  0xae   :  { %961 = vmatpush3.bf16.msra.mxu0 %v958_v10  ;;  %v490_v10 = vld [vmem:[#allocation2 + $0x230] sm:$0xff] }
  0xaf   :  { %963 = vmatprep.subr.bf16.mxu0 %v962_v13  ;;  %v1022_v12 = vpack.c.bf16 %v491_v11, %v490_v10 }
  0xb2   :  { %965 = vmatpush3.bf16.msra.mxu0 %v962_v13  ;;  %v492_v13 = vld [vmem:[#allocation2 + $0x240] sm:$0xff] }
  0xb3   :  { %967 = vmatprep.subr.bf16.mxu0 %v966_v16  ;;  %v1026_v15 = vpack.c.bf16 %v493_v14, %v492_v13 }
  0xb6   :  { %969 = vmatpush3.bf16.msra.mxu0 %v966_v16  ;;  %v494_v16 = vld [vmem:[#allocation2 + $0x250] sm:$0xff] }
  0xb7   :  { %971 = vmatprep.subr.bf16.mxu0 %v970_v28 }
  0xba   :  { %973 = vmatpush3.bf16.msra.mxu0 %v970_v28  ;;  %v496_v28 = vld [vmem:[#allocation2 + $0x260] sm:$0xff] }
  0xbb   :  { %975 = vmatprep.subr.bf16.mxu0 %v974_v31  ;;  %v1034_v30 = vpack.c.bf16 %v497_v29, %v496_v28 }
  0xbe   :  { %977 = vmatpush3.bf16.msra.mxu0 %v974_v31  ;;  %v498_v31 = vld [vmem:[#allocation2 + $0x270] sm:$0xff] }
  0xbf   :  { %1011 = vmatprep.subr.bf16.mxu0 %v1010_v4  ;;  %v1038_v33 = vpack.c.bf16 %v499_v32, %v498_v31 }
 0x174   :  { %v741_v18 = vpop.f32.mrb[0].mxu0 }
 0x175   :  { %v164_v19 = vadd.f32 %v741_v18, %v608_v17  ;;  %v158_v20 = vpop.f32.mrb[1].mxu0 }
 0x176   :  { %v159_v21 = vadd.f32 %v608_v17, %v158_v20  ;;  %v495_v17 = vld [vmem:[#allocation2 + $0x258] sm:$0xff] }
 0x177   :  { %v168_v22 = vmul.f32 0.2, %v164_v19  ;;  %v1030_v18 = vpack.c.bf16 %v495_v17, %v494_v16 }
 0x178   :  { %v167_v23 = vmul.f32 0.2, %v159_v21 }
 0x179   :  { %v170_v25 = vmax.f32 %v164_v19, %v168_v22  ;;  %v612_v19 = vld [vmem:[%s1192_s4 + $0x2] ss:$0 sm:$0xff] }
 0x17a   :  { %v169_v24 = vmax.f32 %v159_v21, %v167_v23 }
 0x17c   :  { %774 = vmatprep.mubr.f32.mxu1 %v169_v24 }
 0x17d   :  { %775 = vmatmul.mubr.f32.vlgmr.msra.gmra.mrb[0].mxu1 %v170_v25 }
 0x17e   :  { %981 = vmatpush3.bf16.msra.mxu1 %v978_v35 }
 0x17f   :  { %983 = vmatprep.subr.bf16.mxu1 %v982_v37 }
 0x182   :  { %985 = vmatpush3.bf16.msra.mxu1 %v982_v37 }
 0x183   :  { %987 = vmatprep.subr.bf16.mxu1 %v986_v40 }
 0x186   :  { %989 = vmatpush3.bf16.msra.mxu1 %v986_v40 }
 0x187   :  { %991 = vmatprep.subr.bf16.mxu1 %v990_v43 }
 0x18a   :  { %993 = vmatpush3.bf16.msra.mxu1 %v990_v43  ;;  %v616_v43 = vld [vmem:[%s1192_s4 + $0x4] ss:$0 sm:$0xff] }
 0x18b   :  { %995 = vmatprep.subr.bf16.mxu1 %v994_v46 }
 0x18e   :  { %997 = vmatpush3.bf16.msra.mxu1 %v994_v46 }
 0x18f   :  { %999 = vmatprep.subr.bf16.mxu1 %v998_v49 }
 0x192   :  { %1001 = vmatpush3.bf16.msra.mxu1 %v998_v49 }
 0x193   :  { %1003 = vmatprep.subr.bf16.mxu1 %v1002_v61 }
 0x196   :  { %1005 = vmatpush3.bf16.msra.mxu1 %v1002_v61 }
 0x197   :  { %1007 = vmatprep.subr.bf16.mxu1 %v1006_v0 }
 0x19a   :  { %1009 = vmatpush3.bf16.msra.mxu1 %v1006_v0 }
 0x250   :  { %v776_v51 = vpop.f32.mrb[0].mxu1 }
 0x251   :  { %v268_v52 = vadd.f32 %v776_v51, %v610_v50  ;;  %v262_v53 = vpop.f32.mrb[1].mxu1 }
 0x252   :  { %v263_v54 = vadd.f32 %v610_v50, %v262_v53 }
 0x253   :  { %v272_v55 = vmul.f32 0.2, %v268_v52 }
 0x254   :  { %v271_v56 = vmul.f32 0.2, %v263_v54 }
 0x255   :  { %v274_v58 = vmax.f32 %v268_v52, %v272_v55 }
 0x256   :  { %v273_v57 = vmax.f32 %v263_v54, %v271_v56 }
 0x258   :  { %809 = vmatprep.mubr.f32.mxu0 %v273_v57 }
 0x259   :  { %810 = vmatmul.mubr.f32.vlgmr.msra.gmra.mrb[2].mxu0 %v274_v58 }
 0x25a   :  { %1013 = vmatpush3.bf16.msra.mxu0 %v1010_v4 }
 0x25b   :  { %1015 = vmatprep.subr.bf16.mxu0 %v1014_v6 }
 0x25e   :  { %1017 = vmatpush3.bf16.msra.mxu0 %v1014_v6 }
 0x25f   :  { %1019 = vmatprep.subr.bf16.mxu0 %v1018_v9 }
 0x262   :  { %1021 = vmatpush3.bf16.msra.mxu0 %v1018_v9 }
 0x263   :  { %1023 = vmatprep.subr.bf16.mxu0 %v1022_v12 }
 0x266   :  { %1025 = vmatpush3.bf16.msra.mxu0 %v1022_v12 }
 0x267   :  { %1027 = vmatprep.subr.bf16.mxu0 %v1026_v15 }
 0x26a   :  { %1029 = vmatpush3.bf16.msra.mxu0 %v1026_v15 }
 0x26b   :  { %1031 = vmatprep.subr.bf16.mxu0 %v1030_v18 }
 0x26e   :  { %1033 = vmatpush3.bf16.msra.mxu0 %v1030_v18 }
 0x26f   :  { %1035 = vmatprep.subr.bf16.mxu0 %v1034_v30 }
 0x272   :  { %1037 = vmatpush3.bf16.msra.mxu0 %v1034_v30 }
 0x273   :  { %1039 = vmatprep.subr.bf16.mxu0 %v1038_v33 }
 0x276   :  { %1041 = vmatpush3.bf16.msra.mxu0 %v1038_v33 }
 0x32c   :  { %v811_v20 = vpop.f32.mrb[2].mxu0 }
 0x32d   :  { %v372_v21 = vadd.f32 %v811_v20, %v612_v19  ;;  %v366_v22 = vpop.f32.mrb[3].mxu0 }
 0x32e   :  { %v367_v23 = vadd.f32 %v612_v19, %v366_v22 }
 0x32f   :  { %v376_v24 = vmul.f32 0.2, %v372_v21 }
 0x330   :  { %v375_v25 = vmul.f32 0.2, %v367_v23 }
 0x331   :  { %v378_v27 = vmax.f32 %v372_v21, %v376_v24 }
 0x332   :  { %v377_v26 = vmax.f32 %v367_v23, %v375_v25 }
 0x334   :  { %844 = vmatprep.mubr.f32.mxu1 %v377_v26 }
 0x335   :  { %845 = vmatmul.mubr.f32.vlgmr.msra.gmra.mrb[2].mxu1 %v378_v27 }
 0x408   :  { %v846_v35 = vpop.f32.mrb[2].mxu1 }
 0x409   :  { %v476_v36 = vadd.f32 %v846_v35, %v614_v34  ;;  %v470_v37 = vpop.f32.mrb[3].mxu1 }
 0x40a   :  { %v471_v38 = vadd.f32 %v614_v34, %v470_v37 }
 0x40b   :  { %v480_v39 = vmul.f32 0.2, %v476_v36 }
 0x40c   :  { %v479_v40 = vmul.f32 0.2, %v471_v38 }
 0x40d   :  { %v482_v42 = vmax.f32 %v476_v36, %v480_v39 }
 0x40e   :  { %v481_v41 = vmax.f32 %v471_v38, %v479_v40 }
 0x410   :  { %879 = vmatprep.mubr.f32.mxu0 %v481_v41 }
 0x411   :  { %880 = vmatmul.mubr.f32.vlgmr.msra.gmra.mrb[4].mxu0 %v482_v42 }
 0x4e4   :  { %v881_v44 = vpop.f32.mrb[4].mxu0 }
 0x4e5   :  { %v580_v45 = vadd.f32 %v881_v44, %v616_v43  ;;  %v574_v46 = vpop.f32.mrb[5].mxu0 }
 0x4e6   :  { %v575_v47 = vadd.f32 %v616_v43, %v574_v46 }
 0x4e7   :  { %v584_v48 = vmul.f32 0.2, %v580_v45 }
 0x4e8   :  { %v583_v49 = vmul.f32 0.2, %v575_v47 }
 0x4e9   :  { %v586_v50 = vmax.f32 %v580_v45, %v584_v48 }
 0x4ea   :  { %v585_v51 = vmax.f32 %v575_v47, %v583_v49 }
 0x4eb   :  { %588 = vst [vmem:[#allocation5 + $0x8] sm:$0xff] %v586_v50 }
 0x4ec   :  { %587 = vst [vmem:[#allocation5] sm:$0xff] %v585_v51 }
 0x4ed   :  { %1081 = shalt.err (!%p1078_p12)
}
 0x4ee   :  { %s1082_s25 = scalar_lea.hbm %s1193_s5, 256 }
 0x4ef   :  { %p1083_p13 = scmp.ne.s32.totalorder %s1193_s5, %s1082_s25  ;;  %p1086_p0 = scmp.lt.u32.totalorder %s1082_s25, %s1193_s5 }
 0x4f1   :  { %p1088_p1 = pnand %p1086_p0, %p1083_p13 }
 0x4f3   :  { %1091 = shalt.err (!%p1088_p1)
}
 0x4f4   :  { %600 = dma.vmem_to_hbm [thread:$0]  %s595_s22, 256, %s1193_s5, [#allocation4], %s1097_s28, %s1097_s28, %s1098_s29  }
 0x4f5   :  { %1094 = dma.done.wait [#allocation4], 256  }
 0x4f6   :  { %1095 = vsyncadd [#allocation4], 4294967040 }
 0x4f7   :  { %604 = vsyncpa [#allocation3], 1 }
 0x4f8   :  { %605 = vsyncpa [#allocation4], 1 }

</bundles_post_ra>
